<compile_context>
chip_gen: v6e
topology: v6e:2x2x1
jax: 0.10.0
libtpu: 0.0.40
codegen_flags: <defaults>
</compile_context>

<pallas_src>
import jax
import jax.numpy as jnp
from jax.experimental import pallas as pl
from jax.experimental.pallas import tpu as pltpu

PATCH = 4
EMBED_DIM = 128     # lane-dense feature dim (multiple of 128)
MLP_DIM = 256       # lane-dense MLP hidden dim
P_IN_PAD = 128      # C*PATCH*PATCH (=48) zero-padded to a lane-dense contraction dim
LN_EPS = 1e-5


# ----------------------------- Pallas kernel --------------------------------
def backbone_kernel(patches_ref, w_emb_ref, vecs_ref, w1_ref, w2_ref, out_ref):
    """One grid step == Bt images: (Bt*N, Kpad) tokens -> pooled (Bt, D) features."""
    m, _ = patches_ref.shape                     # M = Bt * N token rows
    bt, d = out_ref.shape
    n_tok = m // bt

    x = patches_ref[...]                                                  # (M, Kpad) bf16

    # Packed small vectors: row0=b_emb, row1=gamma, row2=beta, row3=b1, row4=b2.
    vecs = vecs_ref[...]                                                  # (8, MLP_DIM) f32
    b_emb = vecs[0:1, :EMBED_DIM]
    gamma = vecs[1:2, :EMBED_DIM]
    beta = vecs[2:3, :EMBED_DIM]
    b1 = vecs[3:4, :]
    b2 = vecs[4:5, :EMBED_DIM]

    # Patch embedding: conv(k=4, s=4) as a dense matmul (bf16 MXU, f32 accumulate).
    emb = jnp.dot(x, w_emb_ref[...],
                  preferred_element_type=jnp.float32) + b_emb             # (M, D) f32

    # LayerNorm over D: centered two-pass variance (numerically robust), f32 throughout.
    mu = jnp.mean(emb, axis=-1, keepdims=True)
    cen = emb - mu
    var = jnp.mean(cen * cen, axis=-1, keepdims=True)
    normed = cen * jax.lax.rsqrt(var + LN_EPS) * gamma + beta

    # MLP block with GELU.  Matmuls accumulate in f32; the epilogue (GELU + w2 operand)
    # runs in bf16, which is native on v6e/v7x VPU/EUP.
    # TODO(synk): timm/PyTorch nn.GELU defaults to the exact erf form; tanh approx used
    # here for robust Mosaic lowering (features differ slightly from the torch model).
    h = jnp.dot(normed.astype(jnp.bfloat16), w1_ref[...],
                preferred_element_type=jnp.float32) + b1                  # (M, H) f32
    h = jax.nn.gelu(h.astype(jnp.bfloat16), approximate=True)            # (M, H) bf16
    mlp = jnp.dot(h, w2_ref[...],
                  preferred_element_type=jnp.float32) + b2                # (M, D) f32

    tok = emb + mlp                                                       # residual, f32

    # Per-image global average pool over the token axis; single dense (Bt, D) store.
    out_ref[...] = jnp.mean(tok.reshape(bt, n_tok, d), axis=1)            # (Bt, D)


# ------------------------------ host helpers ---------------------------------
def _choose_bt(batch, n_tok, target_rows=256, max_rows=2048):
    """Images per grid step.

    Prefer the smallest divisor of `batch` that fills >= target_rows MXU rows
    (keeps the grid as long as possible -> megacore on v7x) while respecting
    the (8,128) block divisibility rules; otherwise collapse to a single step.
    """
    cands = [d for d in range(1, batch + 1)
             if batch % d == 0 and d * n_tok <= max_rows
             and (d == batch or (d % 8 == 0 and (d * n_tok) % 8 == 0))]
    if not cands:
        return batch
    reaching = [d for d in cands if d * n_tok >= target_rows]
    return min(reaching) if reaching else max(cands)


def make_params(key, in_chans=3, patch=PATCH, embed_dim=EMBED_DIM,
                mlp_dim=MLP_DIM, p_in_pad=P_IN_PAD):
    p_in = in_chans * patch * patch
    assert p_in <= p_in_pad
    ks = jax.random.split(key, 3)
    w_emb = jnp.zeros((p_in_pad, embed_dim), jnp.float32)
    w_emb = w_emb.at[:p_in].set(
        jax.random.normal(ks[0], (p_in, embed_dim), jnp.float32) * 0.05)

    # Pack the five small f32 vectors into a single (8, mlp_dim) operand:
    # row0=b_emb, row1=gamma, row2=beta, row3=b1, row4=b2, rows5-7 unused.
    vecs = jnp.zeros((8, mlp_dim), jnp.float32)
    vecs = vecs.at[1, :embed_dim].set(1.0)        # gamma = ones; biases/beta stay zero

    return dict(
        # matmul operands stored in bf16 (halved DMA bytes, bf16-native MXU),
        # packed vectors stay f32 (elementwise math stays f32).
        w_emb=w_emb.astype(jnp.bfloat16),
        vecs=vecs,
        w1=(jax.random.normal(ks[1], (embed_dim, mlp_dim), jnp.float32)
            * 0.05).astype(jnp.bfloat16),
        w2=(jax.random.normal(ks[2], (mlp_dim, embed_dim), jnp.float32)
            * 0.05).astype(jnp.bfloat16),
    )


@jax.jit
def pytorch_image_model_wrapper_forward(x, params):
    """x: NCHW float32. Returns tuple of features, each with dim >= 4 (B, D, 1, 1)."""
    B, C, H, W = x.shape
    gh, gw = H // PATCH, W // PATCH
    N = gh * gw
    p_in = C * PATCH * PATCH
    D = EMBED_DIM
    Hd = MLP_DIM

    # Unfold NCHW into flat token rows (B*N, C*p*p) in (c, kh, kw) order, matching the
    # PyTorch conv weight flattening; zero-pad the contraction dim to 128 lanes, bf16.
    # At these sizes the materialized patch array is negligible; no fusion hint needed.
    xp = x.reshape(B, C, gh, PATCH, gw, PATCH).transpose(0, 2, 4, 1, 3, 5)
    patches = xp.reshape(B * N, p_in)
    patches = jnp.pad(patches, ((0, 0), (0, P_IN_PAD - p_in))).astype(jnp.bfloat16)

    # Images per grid step: fill the MXU M-dimension (>=256 rows when possible) while
    # keeping the grid as long as possible for v7x's two TensorCores.
    Bt = _choose_bt(B, N)
    rows = Bt * N
    grid = (B // Bt,)

    # Rough per-step VMEM footprint; only raise the scoped-VMEM limit when the default
    # (16 MiB on v5e) would be exceeded by large per-step token tiles.
    bytes_est = (
        2 * rows * P_IN_PAD * 2                                   # double-buffered patches
        + 2 * (P_IN_PAD * D + D * Hd + Hd * D) * 2                # resident bf16 weights
        + 2 * 8 * Hd * 4                                          # packed vectors
        + 2 * Bt * D * 4                                          # double-buffered output
        + rows * (3 * D + Hd) * 4                                 # f32 intermediates
    )
    cp_kwargs = dict(dimension_semantics=("parallel",))
    if bytes_est > 12 * 1024 * 1024:
        cp_kwargs["vmem_limit_bytes"] = min(int(bytes_est * 2), 64 * 1024 * 1024)

    const2d = lambda b: (0, 0)
    pooled = pl.pallas_call(
        backbone_kernel,
        out_shape=jax.ShapeDtypeStruct((B, D), jnp.float32),
        grid_spec=pltpu.PrefetchScalarGridSpec(
            num_scalar_prefetch=0,
            grid=grid,
            in_specs=[
                pl.BlockSpec((rows, P_IN_PAD), lambda b: (b, 0)),   # per-step token tile
                pl.BlockSpec((P_IN_PAD, D), const2d),               # weights: resident
                pl.BlockSpec((8, Hd), const2d),                     # packed vectors
                pl.BlockSpec((D, Hd), const2d),
                pl.BlockSpec((Hd, D), const2d),
            ],
            out_specs=pl.BlockSpec((Bt, D), lambda b: (b, 0)),      # dense (Bt, D) store
        ),
        compiler_params=pltpu.CompilerParams(**cp_kwargs),
    )(patches, params["w_emb"], params["vecs"], params["w1"], params["w2"])

    # Wrapper semantics: unsqueeze(-1) until dim() == 4, return a tuple.
    o = pooled[:, :, None, None]                                          # (B, D, 1, 1)
    return (o,)


if __name__ == "__main__":
    key = jax.random.PRNGKey(0)
    k_x, k_p = jax.random.split(key)

    B, C, H, W = 2, 3, 16, 16                                             # small NCHW image
    x = jax.random.normal(k_x, (B, C, H, W), jnp.float32)
    params = make_params(k_p, in_chans=C)

    feats = pytorch_image_model_wrapper_forward(x, params)
    feats = jax.tree_util.tree_map(jax.block_until_ready, feats)

    assert isinstance(feats, tuple) and len(feats) == 1
    assert feats[0].shape == (B, EMBED_DIM, 1, 1), feats[0].shape
    assert feats[0].dtype == jnp.float32
    assert bool(jnp.all(jnp.isfinite(feats[0])))
    # TODO(synk): actual timm backbone weights / architectures are not reproducible
    # without the timm package; this synthetic backbone stands in for self.model.
    print("KERNEL_OK")
</pallas_src>

<mosaic_0001>
module attributes {stable_mosaic.version = 11 : i64} {
  func.func @backbone_kernel(%arg0: i32, %arg1: memref<32x128xbf16, #tpu.memory_space<vmem>>, %arg2: memref<128x128xbf16, #tpu.memory_space<vmem>>, %arg3: memref<8x256xf32, #tpu.memory_space<vmem>>, %arg4: memref<128x256xbf16, #tpu.memory_space<vmem>>, %arg5: memref<256x128xbf16, #tpu.memory_space<vmem>>, %arg6: memref<2x128xf32, #tpu.memory_space<vmem>>) attributes {dimension_semantics = [#tpu.dimension_semantics<parallel>], iteration_bounds = array<i64: 1>, scalar_prefetch = 0 : i64, scratch_operands = 0 : i64, tpu.core_type = #tpu.core_type<tc>, window_params = [{transform_indices = @transform_0, window_bounds = array<i64: 32, 128>}, {pipeline_mode = #tpu.pipeline_mode<synchronous>, transform_indices = @transform_1, window_bounds = array<i64: 128, 128>}, {pipeline_mode = #tpu.pipeline_mode<synchronous>, transform_indices = @transform_2, window_bounds = array<i64: 8, 256>}, {pipeline_mode = #tpu.pipeline_mode<synchronous>, transform_indices = @transform_3, window_bounds = array<i64: 128, 256>}, {pipeline_mode = #tpu.pipeline_mode<synchronous>, transform_indices = @transform_4, window_bounds = array<i64: 256, 128>}, {transform_indices = @transform_5, window_bounds = array<i64: 2, 128>}]} {
    %c0 = arith.constant 0 : index
    %c0_0 = arith.constant 0 : index
    %0 = vector.load %arg1[%c0, %c0_0] : memref<32x128xbf16, #tpu.memory_space<vmem>>, vector<32x128xbf16>
    %c0_1 = arith.constant 0 : index
    %c0_2 = arith.constant 0 : index
    %1 = vector.load %arg3[%c0_1, %c0_2] : memref<8x256xf32, #tpu.memory_space<vmem>>, vector<8x256xf32>
    %2 = vector.extract_strided_slice %1 {offsets = [0, 0], sizes = [1, 128], strides = [1, 1]} : vector<8x256xf32> to vector<1x128xf32>
    %3 = vector.extract_strided_slice %1 {offsets = [1, 0], sizes = [1, 128], strides = [1, 1]} : vector<8x256xf32> to vector<1x128xf32>
    %4 = vector.extract_strided_slice %1 {offsets = [2, 0], sizes = [1, 128], strides = [1, 1]} : vector<8x256xf32> to vector<1x128xf32>
    %5 = vector.extract_strided_slice %1 {offsets = [3, 0], sizes = [1, 256], strides = [1, 1]} : vector<8x256xf32> to vector<1x256xf32>
    %6 = vector.extract_strided_slice %1 {offsets = [4, 0], sizes = [1, 128], strides = [1, 1]} : vector<8x256xf32> to vector<1x128xf32>
    %c0_3 = arith.constant 0 : index
    %c0_4 = arith.constant 0 : index
    %7 = vector.load %arg2[%c0_3, %c0_4] : memref<128x128xbf16, #tpu.memory_space<vmem>>, vector<128x128xbf16>
    %cst = arith.constant dense<0.000000e+00> : vector<32x128xf32>
    %8 = tpu.matmul %0, %7, %cst {dimension_numbers = #tpu.dot_dimension_numbers<[1], [0], [0], [1], [0, 0, 1, 1], [], []>} : vector<32x128xbf16>, vector<128x128xbf16>, vector<32x128xf32> -> vector<32x128xf32>
    %9 = vector.broadcast %2 : vector<1x128xf32> to vector<32x128xf32>
    %10 = arith.addf %8, %9 : vector<32x128xf32>
    %cst_5 = arith.constant dense<0.000000e+00> : vector<32xf32>
    %11 = vector.multi_reduction <add>, %10, %cst_5 [1] : vector<32x128xf32> to vector<32xf32>
    %12 = vector.shape_cast %11 : vector<32xf32> to vector<32x1xf32>
    %cst_6 = arith.constant 1.280000e+02 : f32
    %13 = vector.broadcast %cst_6 : f32 to vector<32x1xf32>
    %14 = arith.divf %12, %13 : vector<32x1xf32>
    %15 = vector.broadcast %14 : vector<32x1xf32> to vector<32x128xf32>
    %16 = arith.subf %10, %15 : vector<32x128xf32>
    %17 = arith.mulf %16, %16 : vector<32x128xf32>
    %cst_7 = arith.constant dense<0.000000e+00> : vector<32xf32>
    %18 = vector.multi_reduction <add>, %17, %cst_7 [1] : vector<32x128xf32> to vector<32xf32>
    %19 = vector.shape_cast %18 : vector<32xf32> to vector<32x1xf32>
    %cst_8 = arith.constant 1.280000e+02 : f32
    %20 = vector.broadcast %cst_8 : f32 to vector<32x1xf32>
    %21 = arith.divf %19, %20 : vector<32x1xf32>
    %cst_9 = arith.constant 9.99999974E-6 : f32
    %22 = vector.broadcast %cst_9 : f32 to vector<32x1xf32>
    %23 = arith.addf %21, %22 : vector<32x1xf32>
    %24 = math.rsqrt %23 : vector<32x1xf32>
    %25 = vector.broadcast %24 : vector<32x1xf32> to vector<32x128xf32>
    %26 = arith.mulf %16, %25 : vector<32x128xf32>
    %27 = vector.broadcast %3 : vector<1x128xf32> to vector<32x128xf32>
    %28 = arith.mulf %26, %27 : vector<32x128xf32>
    %29 = vector.broadcast %4 : vector<1x128xf32> to vector<32x128xf32>
    %30 = arith.addf %28, %29 : vector<32x128xf32>
    %31 = arith.truncf %30 : vector<32x128xf32> to vector<32x128xbf16>
    %c0_10 = arith.constant 0 : index
    %c0_11 = arith.constant 0 : index
    %32 = vector.load %arg4[%c0_10, %c0_11] : memref<128x256xbf16, #tpu.memory_space<vmem>>, vector<128x256xbf16>
    %cst_12 = arith.constant dense<0.000000e+00> : vector<32x256xf32>
    %33 = tpu.matmul %31, %32, %cst_12 {dimension_numbers = #tpu.dot_dimension_numbers<[1], [0], [0], [1], [0, 0, 1, 1], [], []>} : vector<32x128xbf16>, vector<128x256xbf16>, vector<32x256xf32> -> vector<32x256xf32>
    %34 = vector.broadcast %5 : vector<1x256xf32> to vector<32x256xf32>
    %35 = arith.addf %33, %34 : vector<32x256xf32>
    %36 = arith.truncf %35 : vector<32x256xf32> to vector<32x256xbf16>
    %37 = arith.mulf %36, %36 : vector<32x256xbf16>
    %38 = arith.mulf %36, %37 : vector<32x256xbf16>
    %cst_13 = arith.constant 4.467770e-02 : bf16
    %39 = vector.broadcast %cst_13 : bf16 to vector<32x256xbf16>
    %40 = arith.mulf %39, %38 : vector<32x256xbf16>
    %41 = arith.addf %36, %40 : vector<32x256xbf16>
    %cst_14 = arith.constant 7.968750e-01 : bf16
    %42 = vector.broadcast %cst_14 : bf16 to vector<32x256xbf16>
    %43 = arith.mulf %42, %41 : vector<32x256xbf16>
    %44 = math.tanh %43 : vector<32x256xbf16>
    %cst_15 = arith.constant 1.000000e+00 : bf16
    %45 = vector.broadcast %cst_15 : bf16 to vector<32x256xbf16>
    %46 = arith.addf %45, %44 : vector<32x256xbf16>
    %cst_16 = arith.constant 5.000000e-01 : bf16
    %47 = vector.broadcast %cst_16 : bf16 to vector<32x256xbf16>
    %48 = arith.mulf %47, %46 : vector<32x256xbf16>
    %49 = arith.mulf %36, %48 : vector<32x256xbf16>
    %c0_17 = arith.constant 0 : index
    %c0_18 = arith.constant 0 : index
    %50 = vector.load %arg5[%c0_17, %c0_18] : memref<256x128xbf16, #tpu.memory_space<vmem>>, vector<256x128xbf16>
    %cst_19 = arith.constant dense<0.000000e+00> : vector<32x128xf32>
    %51 = tpu.matmul %49, %50, %cst_19 {dimension_numbers = #tpu.dot_dimension_numbers<[1], [0], [0], [1], [0, 0, 1, 1], [], []>} : vector<32x256xbf16>, vector<256x128xbf16>, vector<32x128xf32> -> vector<32x128xf32>
    %52 = vector.broadcast %6 : vector<1x128xf32> to vector<32x128xf32>
    %53 = arith.addf %51, %52 : vector<32x128xf32>
    %54 = arith.addf %10, %53 : vector<32x128xf32>
    %55 = vector.shape_cast %54 : vector<32x128xf32> to vector<2x16x128xf32>
    %cst_20 = arith.constant dense<0.000000e+00> : vector<2x128xf32>
    %56 = vector.multi_reduction <add>, %55, %cst_20 [1] : vector<2x16x128xf32> to vector<2x128xf32>
    %cst_21 = arith.constant 1.600000e+01 : f32
    %57 = vector.broadcast %cst_21 : f32 to vector<2x128xf32>
    %58 = arith.divf %56, %57 : vector<2x128xf32>
    %c0_22 = arith.constant 0 : index
    %c0_23 = arith.constant 0 : index
    %59 = vector.load %arg6[%c0_22, %c0_23] : memref<2x128xf32, #tpu.memory_space<vmem>>, vector<2x128xf32>
    tpu.vector_store %arg6[%c0_22, %c0_23], %58 {strides = array<i32>} : memref<2x128xf32, #tpu.memory_space<vmem>>, vector<2x128xf32>,
    return
  }
  func.func @transform_0(%arg0: i32) -> (i32, i32) {
    %c0_i32 = arith.constant 0 : i32
    %c0_i32_0 = arith.constant 0 : i32
    return %arg0, %c0_i32 : i32, i32
  }
  func.func @transform_1(%arg0: i32) -> (i32, i32) {
    %c0_i32 = arith.constant 0 : i32
    %c0_i32_0 = arith.constant 0 : i32
    %c0_i32_1 = arith.constant 0 : i32
    return %c0_i32, %c0_i32_0 : i32, i32
  }
  func.func @transform_2(%arg0: i32) -> (i32, i32) {
    %c0_i32 = arith.constant 0 : i32
    %c0_i32_0 = arith.constant 0 : i32
    %c0_i32_1 = arith.constant 0 : i32
    return %c0_i32, %c0_i32_0 : i32, i32
  }
  func.func @transform_3(%arg0: i32) -> (i32, i32) {
    %c0_i32 = arith.constant 0 : i32
    %c0_i32_0 = arith.constant 0 : i32
    %c0_i32_1 = arith.constant 0 : i32
    return %c0_i32, %c0_i32_0 : i32, i32
  }
  func.func @transform_4(%arg0: i32) -> (i32, i32) {
    %c0_i32 = arith.constant 0 : i32
    %c0_i32_0 = arith.constant 0 : i32
    %c0_i32_1 = arith.constant 0 : i32
    return %c0_i32, %c0_i32_0 : i32, i32
  }
  func.func @transform_5(%arg0: i32) -> (i32, i32) {
    %c0_i32 = arith.constant 0 : i32
    %c0_i32_0 = arith.constant 0 : i32
    return %arg0, %c0_i32 : i32, i32
  }
}

</mosaic_0001>

<bundles_post_ra>
// kernel: pytorch_image_model_wrapper_forward.1
= control target key start
LH: loop header
LB: loop body
LE: loop exit
PB: predicated region body
PF: predicated region fallthrough
CT: control target
= control target key end

     0   :  { %s1065_s0 = inlined_call_operand.vmem [shape: bf16[32,128], index: 0, kind: input, shape index: {}]   ;;  %s1066_s1 = inlined_call_operand.vmem [shape: bf16[128,128], index: 1, kind: input, shape index: {}]   ;;  %s1067_s2 = inlined_call_operand.vmem [shape: f32[8,256], index: 2, kind: input, shape index: {}]   ;;  %s1068_s3 = inlined_call_operand.vmem [shape: bf16[128,256], index: 3, kind: input, shape index: {}]   ;;  %s1069_s4 = inlined_call_operand.vmem [shape: bf16[256,128], index: 4, kind: input, shape index: {}]   ;;  %s1070_s5 = inlined_call_operand.hbm [shape: f32[2,128], index: 5, kind: output, shape index: {}]  }
   0x1   :  { %v761_v0 = vld [vmem:[%s1066_s1 + $0x38] sm:$0xff]   ;;  %v762_v1 = vld [vmem:[%s1066_s1 + $0x30] sm:$0xff]   ;;  %v763_v2 = vld [vmem:[%s1066_s1 + $0x28] sm:$0xff]  }
   0x2   :  { %723 = vmatprep.subr.bf16.mxu0 %v761_v0  ;;  %v764_v3 = vld [vmem:[%s1066_s1 + $0x20] sm:$0xff]   ;;  %v765_v5 = vld [vmem:[%s1066_s1 + $0x18] sm:$0xff]   ;;  %v766_v6 = vld [vmem:[%s1066_s1 + $0x10] sm:$0xff]  }
   0x3   :  { %724 = vmatpush3.bf16.msra.mxu0 %v761_v0  ;;  %v769_v4 = vld [vmem:[%s1065_s0] sm:$0xff]   ;;  %v767_v7 = vld [vmem:[%s1066_s1 + $0x8] sm:$0xff]  }
   0x4   :  { %725 = vmatprep.subr.bf16.mxu0 %v762_v1  ;;  %739 = vmatprep.mubr.bf16.mxu0 %v769_v4  ;;  %v768_v8 = vld [vmem:[%s1066_s1] sm:$0xff]  }
   0x7   :  { %726 = vmatpush3.bf16.msra.mxu0 %v762_v1 }
   0x8   :  { %727 = vmatprep.subr.bf16.mxu0 %v763_v2 }
   0xb   :  { %728 = vmatpush3.bf16.msra.mxu0 %v763_v2 }
   0xc   :  { %729 = vmatprep.subr.bf16.mxu0 %v764_v3 }
   0xf   :  { %730 = vmatpush3.bf16.msra.mxu0 %v764_v3 }
  0x10   :  { %731 = vmatprep.subr.bf16.mxu0 %v765_v5 }
  0x13   :  { %732 = vmatpush3.bf16.msra.mxu0 %v765_v5 }
  0x14   :  { %733 = vmatprep.subr.bf16.mxu0 %v766_v6 }
  0x17   :  { %734 = vmatpush3.bf16.msra.mxu0 %v766_v6 }
  0x18   :  { %735 = vmatprep.subr.bf16.mxu0 %v767_v7 }
  0x19   :  { %10 = vsyncpa [#allocation3], 0  ;;  %v770_v9 = vld [vmem:[%s1065_s0 + $0x8] sm:$0xff]   ;;  %v48_v10 = vlaneseq  ;;  %v917_v13 = vld [vmem:[%s1067_s2] sm:$0xff]  ;;  %v849_v50 = vmov 0   ;;  %vm625_vm0 = vcmask 1041409  }
  0x1a   :  { %v771_v23 = vld [vmem:[%s1068_s3 + $0x74] ss:$8 sps:$4 sm:$0xff]   ;;  %v773_v24 = vld [vmem:[%s1068_s3 + $0x70] ss:$8 sps:$4 sm:$0xff]   ;;  %v774_v41 = vld [vmem:[%s1068_s3 + $0x64] ss:$8 sps:$4 sm:$0xff]   ;;  %360 = vmatprep.mubr.bf16.mxu1 %v849_v50 }
  0x1b   :  { %736 = vmatpush3.bf16.msra.mxu0 %v767_v7  ;;  %v911_v11 = vshrl.u32 %v48_v10, 7  ;;  %328 = vmatprep.subr.bf16.mxu1 %v771_v23  ;;  %v776_v42 = vld [vmem:[%s1068_s3 + $0x60] ss:$8 sps:$4 sm:$0xff]   ;;  %v777_v43 = vld [vmem:[%s1068_s3 + $0x54] ss:$8 sps:$4 sm:$0xff]  }
  0x1c   :  { %737 = vmatprep.subr.bf16.mxu0 %v768_v8  ;;  %329 = vmatpush1.bf16.msra.mxu1 %v773_v24  ;;  %v779_v44 = vld [vmem:[%s1068_s3 + $0x50] ss:$8 sps:$4 sm:$0xff]   ;;  %v780_v45 = vld [vmem:[%s1068_s3 + $0x44] ss:$8 sps:$4 sm:$0xff]   ;;  %v782_v46 = vld [vmem:[%s1068_s3 + $0x40] ss:$8 sps:$4 sm:$0xff]  }
  0x1d   :  { %v50_v12 = vsub.s32 0, %v911_v11  ;;  %330 = vmatprep.subr.bf16.mxu1 %v774_v41  ;;  %v783_v47 = vld [vmem:[%s1068_s3 + $0x34] ss:$8 sps:$4 sm:$0xff]   ;;  %v785_v48 = vld [vmem:[%s1068_s3 + $0x30] ss:$8 sps:$4 sm:$0xff]   ;;  %v208_v4 = vsub.s32 1, %v911_v11 }
  0x1e   :  { %v786_v49 = vld [vmem:[%s1068_s3 + $0x24] ss:$8 sps:$4 sm:$0xff]   ;;  %v788_v51 = vld [vmem:[%s1068_s3 + $0x20] ss:$8 sps:$4 sm:$0xff]   ;;  %v789_v52 = vld [vmem:[%s1068_s3 + $0x14] ss:$8 sps:$4 sm:$0xff]  }
  0x1f   :  { %738 = vmatpush3.bf16.msra.mxu0 %v768_v8  ;;  %v51_v14 = vrot.slane %v917_v13, %v50_v12  ;;  %v791_v53 = vld [vmem:[%s1068_s3 + $0x10] ss:$8 sps:$4 sm:$0xff]   ;;  %v792_v54 = vld [vmem:[%s1068_s3 + $0x4] ss:$8 sps:$4 sm:$0xff]   ;;  %v794_v55 = vld [vmem:[%s1068_s3] ss:$8 sps:$4 sm:$0xff]   ;;  %v209_v7 = vrot.slane %v917_v13, %v208_v4 }
  0x20   :  { %331 = vmatpush1.bf16.msra.mxu1 %v776_v42  ;;  %v216_v8 = vsub.s32 2, %v911_v11  ;;  %v804_v41 = vld [vmem:[%s1069_s4 + $0x18] sm:$0xff]   ;;  %v805_v42 = vld [vmem:[%s1069_s4 + $0x50] sm:$0xff]  }
  0x21   :  { %332 = vmatprep.subr.bf16.mxu1 %v777_v43  ;;  %v806_v43 = vld [vmem:[%s1069_s4 + $0x10] sm:$0xff]  }
  0x22   :  { %740 = vmatmul.mubr.bf16.vlgmr.msra.gmra.mxu0 %v770_v9 }
  0x24   :  { %333 = vmatpush1.bf16.msra.mxu1 %v779_v44  ;;  %v807_v44 = vld [vmem:[%s1069_s4 + $0x48] sm:$0xff]  }
  0x25   :  { %334 = vmatprep.subr.bf16.mxu1 %v780_v45  ;;  %v808_v45 = vld [vmem:[%s1069_s4 + $0x8] sm:$0xff]  }
  0x28   :  { %335 = vmatpush1.bf16.msra.mxu1 %v782_v46  ;;  %v809_v46 = vld [vmem:[%s1069_s4 + $0x40] sm:$0xff]  }
  0x29   :  { %336 = vmatprep.subr.bf16.mxu1 %v783_v47  ;;  %v810_v47 = vld [vmem:[%s1069_s4] sm:$0xff]  }
  0x2c   :  { %337 = vmatpush1.bf16.msra.mxu1 %v785_v48  ;;  %v242_v48 = vsub.s32 3, %v911_v11 }
  0x2d   :  { %338 = vmatprep.subr.bf16.mxu1 %v786_v49 }
  0x30   :  { %339 = vmatpush1.bf16.msra.mxu1 %v788_v51  ;;  %v243_v51 = vrot.slane %v917_v13, %v242_v48 }
  0x31   :  { %340 = vmatprep.subr.bf16.mxu1 %v789_v52 }
  0x34   :  { %341 = vmatpush1.bf16.msra.mxu1 %v791_v53 }
  0x35   :  { %342 = vmatprep.subr.bf16.mxu1 %v792_v54 }
  0x38   :  { %343 = vmatpush1.bf16.msra.mxu1 %v794_v55 }
  0xe2   :  { %v741_v15 = vpop.f32.mrf.mxu0 }
  0xe3   :  { %v920_v16 = vadd.f32 %v741_v15, %v51_v14 }
  0xe4   :  { %v146_v17 = vpop.f32.mrf.mxu0 }
  0xe5   :  { %v922_v18 = vadd.f32 %v146_v17, %v51_v14  ;;  %165 = vadd.xlane.f32.xlu1 %v920_v16 }
  0xe6   :  { %v742_v19 = vpop.f32.mrf.mxu0 }
  0xe7   :  { %v925_v20 = vadd.f32 %v742_v19, %v51_v14  ;;  %161 = vadd.xlane.f32.xlu0 %v922_v18 }
  0xe8   :  { %v149_v21 = vpop.f32.mrf.mxu0 }
  0xe9   :  { %v928_v22 = vadd.f32 %v149_v21, %v51_v14  ;;  %167 = vadd.xlane.f32.xlu1 %v925_v20  ;;  %v217_v14 = vrot.slane %v917_v13, %v216_v8 }
  0xeb   :  { %163 = vadd.xlane.f32.xlu0 %v928_v22 }
 0x16e   :  { %v166_v25 = vpop.xlane.xlu1 %165 }
 0x16f   :  { %v172_v27 = vmul.f32 0.0078125, %v166_v25 }
 0x170   :  { %v162_v26 = vpop.xlane.xlu0 %161 }
 0x171   :  { %v170_v28 = vmul.f32 0.0078125, %v162_v26  ;;  %v942_v32 = vsub.f32 %v920_v16, %v172_v27 }
 0x172   :  { %v168_v29 = vpop.xlane.xlu1 %167 }
 0x173   :  { %v939_v30 = vsub.f32 %v922_v18, %v170_v28  ;;  %v173_v33 = vmul.f32 0.0078125, %v168_v29  ;;  %v180_v38 = vmul.f32 %v942_v32, %v942_v32 }
 0x174   :  { %v164_v31 = vpop.xlane.xlu0 %163 }
 0x175   :  { %v171_v34 = vmul.f32 0.0078125, %v164_v31  ;;  %v178_v35 = vmul.f32 %v939_v30, %v939_v30  ;;  %v948_v37 = vsub.f32 %v925_v20, %v173_v33  ;;  %v795_v33 = vld [vmem:[%s1069_s4 + $0x78] sm:$0xff]  }
 0x176   :  { %695 = vmatprep.subr.bf16.mxu0 %v795_v33  ;;  %743 = vmatprep.subr.bf16.mxu1 %v795_v33 }
 0x177   :  { %v175_v36 = vsub.f32 %v928_v22, %v171_v34  ;;  %182 = vadd.xlane.f32.xlu0 %v178_v35  ;;  %v181_v40 = vmul.f32 %v948_v37, %v948_v37  ;;  %v796_v34 = vld [vmem:[%s1069_s4 + $0x38] sm:$0xff]   ;;  %v798_v35 = vld [vmem:[%s1069_s4 + $0x30] sm:$0xff]  }
 0x178   :  { %696 = vmatpush3.bf16.msra.mxu0 %v796_v34 }
 0x179   :  { %v179_v39 = vmul.f32 %v175_v36, %v175_v36 }
 0x17b   :  { %186 = vadd.xlane.f32.xlu0 %v180_v38  ;;  %184 = vadd.xlane.f32.xlu1 %v179_v39  ;;  %v801_v38 = vld [vmem:[%s1069_s4 + $0x60] sm:$0xff]  }
 0x17c   :  { %v802_v39 = vld [vmem:[%s1069_s4 + $0x20] sm:$0xff]  }
 0x17f   :  { %188 = vadd.xlane.f32.xlu1 %v181_v40  ;;  %v803_v40 = vld [vmem:[%s1069_s4 + $0x58] sm:$0xff]  }
 0x200   :  { %v183_v56 = vpop.xlane.xlu0 %182 }
 0x201   :  { %v190_v57 = vmul.f32 0.0078125, %v183_v56 }
 0x203   :  { %v194_v58 = vadd.f32 1e-05, %v190_v57 }
 0x204   :  { %v185_v59 = vpop.xlane.xlu1 %184  ;;  %v187_v60 = vpop.xlane.xlu0 %186 }
 0x205   :  { %811 = vrsqrt.f32 %v194_v58  ;;  %v191_v61 = vmul.f32 0.0078125, %v185_v59  ;;  %v192_v62 = vmul.f32 0.0078125, %v187_v60 }
 0x207   :  { %v195_v63 = vadd.f32 1e-05, %v191_v61  ;;  %v196_v0 = vadd.f32 1e-05, %v192_v62 }
 0x208   :  { %v189_v1 = vpop.xlane.xlu1 %188 }
 0x209   :  { %813 = vrsqrt.f32 %v195_v63  ;;  %v193_v2 = vmul.f32 0.0078125, %v189_v1 }
 0x20a   :  { %815 = vrsqrt.f32 %v196_v0 }
 0x20b   :  { %v197_v3 = vadd.f32 1e-05, %v193_v2 }
 0x20d   :  { %817 = vrsqrt.f32 %v197_v3 }
 0x212   :  { %v812_v5 = vpop.eup %811 }
 0x213   :  { %v202_v6 = vmul.f32 %v812_v5, %v939_v30 }
 0x215   :  { %v210_v12 = vmul.f32 %v209_v7, %v202_v6 }
 0x216   :  { %v814_v9 = vpop.eup %813 }
 0x217   :  { %v203_v10 = vmul.f32 %v814_v9, %v175_v36  ;;  %v816_v15 = vpop.eup %815  ;;  %v218_v21 = vadd.f32 %v217_v14, %v210_v12  ;;  %v799_v36 = vld [vmem:[%s1069_s4 + $0x68] sm:$0xff]  }
 0x218   :  { %v204_v24 = vmul.f32 %v816_v15, %v942_v32  ;;  %v797_v32 = vld [vmem:[%s1069_s4 + $0x70] sm:$0xff]  }
 0x219   :  { %v211_v17 = vmul.f32 %v209_v7, %v203_v10  ;;  %697 = vmatprep.subr.bf16.mxu0 %v797_v32 }
 0x21a   :  { %v818_v19 = vpop.eup %817  ;;  %v212_v28 = vmul.f32 %v209_v7, %v204_v24  ;;  %698 = vmatpush3.bf16.msra.mxu0 %v798_v35 }
 0x21b   :  { %v219_v23 = vadd.f32 %v217_v14, %v211_v17  ;;  %v205_v25 = vmul.f32 %v818_v19, %v948_v37  ;;  %v800_v37 = vld [vmem:[%s1069_s4 + $0x28] sm:$0xff]   ;;  %699 = vmatprep.subr.bf16.mxu0 %v799_v36 }
 0x21c   :  { %v220_v30 = vadd.f32 %v217_v14, %v212_v28 }
 0x21d   :  { %v222_v26 = vpack.c.bf16 %v219_v23, %v218_v21  ;;  %v213_v27 = vmul.f32 %v209_v7, %v205_v25 }
 0x21e   :  { %700 = vmatpush3.bf16.msra.mxu0 %v800_v37 }
 0x21f   :  { %361 = vmatmul.mubr.bf16.vlgmr.msra.gmra.mxu1 %v222_v26  ;;  %v221_v29 = vadd.f32 %v217_v14, %v213_v27  ;;  %701 = vmatprep.subr.bf16.mxu0 %v801_v38 }
 0x220   :  { %370 = vmatprep.mubr.bf16.mxu1 %v849_v50  ;;  %751 = vmatpush3.bf16.msra.mxu1 %v796_v34  ;;  %v31_v50 = vld [vmem:[%s1067_s2 + $0x8] sm:$0xff]  ;;  %s850_s2 = smov [#allocation2]  }
 0x221   :  { %v223_v31 = vpack.c.bf16 %v221_v29, %v220_v30  ;;  %744 = vmatprep.subr.bf16.mxu1 %v797_v32  ;;  %v247_v53 = vrot.slane %v31_v50, %v242_v48  ;;  %v455_v50 = vsub.s32 4, %v911_v11  ;;  %s635_s4 = sshll.u32 %s850_s2, 4  ;;  %s636_s4 = int_to_ptr.vmem [resolvable:$true] %s635_s4 }
 0x222   :  { %702 = vmatpush3.bf16.msra.mxu0 %v802_v39  ;;  %s827_s23 = scalar_lea.vmem %s636_s4, 32  ;;  %p832_p1 = scmp.lt.s32.totalorder %s636_s4, %s636_s4 }
 0x223   :  { %703 = vmatprep.subr.bf16.mxu0 %v803_v40  ;;  %p828_p0 = scmp.ne.s32.totalorder %s636_s4, %s827_s23  ;;  %p833_p2 = scmp.lt.s32.totalorder %s827_s23, %s827_s23 }
 0x224   :  { %752 = vmatpush3.bf16.msra.mxu1 %v798_v35 }
 0x225   :  { %745 = vmatprep.subr.bf16.mxu1 %v799_v36  ;;  %p834_p3 = por %p833_p2, %p832_p1 }
 0x226   :  { %704 = vmatpush3.bf16.msra.mxu0 %v804_v41 }
 0x227   :  { %371 = vmatmul.mubr.bf16.gmra.mxu1 %v223_v31  ;;  %705 = vmatprep.subr.bf16.mxu0 %v805_v42  ;;  %p835_p4 = pnand %p834_p3, %p828_p0 }
 0x228   :  { %753 = vmatpush3.bf16.msra.mxu1 %v800_v37 }
 0x229   :  { %746 = vmatprep.subr.bf16.mxu1 %v801_v38 }
 0x22a   :  { %706 = vmatpush3.bf16.msra.mxu0 %v806_v43 }
 0x22b   :  { %707 = vmatprep.subr.bf16.mxu0 %v807_v44 }
 0x22c   :  { %754 = vmatpush3.bf16.msra.mxu1 %v802_v39 }
 0x22d   :  { %747 = vmatprep.subr.bf16.mxu1 %v803_v40 }
 0x22e   :  { %708 = vmatpush3.bf16.msra.mxu0 %v808_v45 }
 0x22f   :  { %709 = vmatprep.subr.bf16.mxu0 %v809_v46 }
 0x230   :  { %755 = vmatpush3.bf16.msra.mxu1 %v804_v41 }
 0x231   :  { %748 = vmatprep.subr.bf16.mxu1 %v805_v42 }
 0x232   :  { %710 = vmatpush3.bf16.msra.mxu0 %v810_v47 }
 0x234   :  { %756 = vmatpush3.bf16.msra.mxu1 %v806_v43 }
 0x235   :  { %749 = vmatprep.subr.bf16.mxu1 %v807_v44 }
 0x238   :  { %757 = vmatpush3.bf16.msra.mxu1 %v808_v45 }
 0x239   :  { %750 = vmatprep.subr.bf16.mxu1 %v809_v46 }
 0x23c   :  { %758 = vmatpush3.bf16.msra.mxu1 %v810_v47 }
 0x2df   :  { %v362_v49 = vpop.f32.mrf.mxu1 }
 0x2e0   :  { %v363_v55 = vadd.f32 %v362_v49, %v243_v51 }
 0x2e1   :  { %v364_v52 = vpop.f32.mrf.mxu1 }
 0x2e2   :  { %v365_v58 = vadd.f32 %v364_v52, %v247_v53 }
 0x2e3   :  { %v366_v54 = vpop.f32.mrf.mxu1 }
 0x2e4   :  { %v367_v56 = vadd.f32 %v366_v54, %v243_v51 }
 0x2e5   :  { %v368_v57 = vpop.f32.mrf.mxu1 }
 0x2e6   :  { %v381_v59 = vpack.c.bf16 %v367_v56, %v363_v55  ;;  %v369_v60 = vadd.f32 %v368_v57, %v247_v53 }
 0x2e7   :  { %v372_v61 = vpop.f32.mrf.mxu1 }
 0x2e8   :  { %v385_v62 = vmul.bf16 %v381_v59, %v381_v59  ;;  %v382_v63 = vpack.c.bf16 %v369_v60, %v365_v58  ;;  %v373_v6 = vadd.f32 %v372_v61, %v243_v51 }
 0x2e9   :  { %v374_v0 = vpop.f32.mrf.mxu1 }
 0x2ea   :  { %v389_v1 = vmul.bf16 %v385_v62, %v381_v59  ;;  %v386_v2 = vmul.bf16 %v382_v63, %v382_v63  ;;  %v375_v8 = vadd.f32 %v374_v0, %v247_v53 }
 0x2eb   :  { %v376_v3 = vpop.f32.mrf.mxu1 }
 0x2ec   :  { %v393_v4 = vmul.bf16 1027030327, %v389_v1  ;;  %v390_v5 = vmul.bf16 %v386_v2, %v382_v63  ;;  %v377_v7 = vadd.f32 %v376_v3, %v243_v51 }
 0x2ed   :  { %v378_v9 = vpop.f32.mrf.mxu1 }
 0x2ee   :  { %v397_v10 = vadd.bf16 %v393_v4, %v381_v59  ;;  %v394_v12 = vmul.bf16 1027030327, %v390_v5  ;;  %v383_v14 = vpack.c.bf16 %v377_v7, %v373_v6  ;;  %v379_v15 = vadd.f32 %v378_v9, %v247_v53 }
 0x2ef   :  { %v456_v53 = vrot.slane %v917_v13, %v455_v50 }
 0x2f0   :  { %v401_v17 = vmul.bf16 1061961548, %v397_v10  ;;  %v398_v19 = vadd.bf16 %v394_v12, %v382_v63  ;;  %v387_v21 = vmul.bf16 %v383_v14, %v383_v14  ;;  %v384_v23 = vpack.c.bf16 %v379_v15, %v375_v8 }
 0x2f2   :  { %819 = vtanh.bf16 %v401_v17  ;;  %v391_v24 = vmul.bf16 %v387_v21, %v383_v14  ;;  %v388_v25 = vmul.bf16 %v384_v23, %v384_v23  ;;  %v402_v26 = vmul.bf16 1061961548, %v398_v19 }
 0x2f4   :  { %v395_v27 = vmul.bf16 1027030327, %v391_v24  ;;  %v392_v28 = vmul.bf16 %v388_v25, %v384_v23  ;;  %821 = vtanh.bf16 %v402_v26 }
 0x2f6   :  { %v399_v29 = vadd.bf16 %v395_v27, %v383_v14  ;;  %v396_v30 = vmul.bf16 1027030327, %v392_v28 }
 0x2f8   :  { %v403_v31 = vmul.bf16 1061961548, %v399_v29  ;;  %v400_v33 = vadd.bf16 %v396_v30, %v384_v23 }
 0x2fa   :  { %823 = vtanh.bf16 %v403_v31  ;;  %v404_v34 = vmul.bf16 1061961548, %v400_v33 }
 0x2fc   :  { %825 = vtanh.bf16 %v404_v34 }
 0x300   :  { %v820_v32 = vpop.eup %819 }
 0x301   :  { %v409_v35 = vadd.bf16 1065369472, %v820_v32 }
 0x302   :  { %v822_v36 = vpop.eup %821 }
 0x303   :  { %v410_v37 = vadd.bf16 1065369472, %v822_v36  ;;  %v413_v38 = vmul.bf16 1056980736, %v409_v35 }
 0x305   :  { %v414_v39 = vmul.bf16 1056980736, %v410_v37  ;;  %v417_v42 = vmul.bf16 %v413_v38, %v381_v59 }
 0x307   :  { %v418_v40 = vmul.bf16 %v414_v39, %v382_v63 }
 0x308   :  { %v824_v41 = vpop.eup %823 }
 0x309   :  { %v411_v43 = vadd.bf16 1065369472, %v824_v41  ;;  %585 = vmatprep.mubr.bf16.mxu0 %v418_v40 }
 0x30a   :  { %v826_v44 = vpop.eup %825  ;;  %586 = vmatmul.mubr.bf16.vlgmr.msra.gmra.mxu0 %v417_v42 }
 0x30b   :  { %v412_v45 = vadd.bf16 1065369472, %v826_v44  ;;  %v415_v46 = vmul.bf16 1056980736, %v411_v43 }
 0x30d   :  { %v416_v47 = vmul.bf16 1056980736, %v412_v45  ;;  %v419_v49 = vmul.bf16 %v415_v46, %v383_v14 }
 0x30f   :  { %v420_v48 = vmul.bf16 %v416_v47, %v384_v23 }
 0x311   :  { %593 = vmatprep.mubr.bf16.mxu1 %v420_v48 }
 0x312   :  { %594 = vmatmul.mubr.bf16.vlgmr.msra.gmra.mxu1 %v419_v49 }
 0x3ca   :  { %v711_v51 = vpop.f32.mrf.mxu0 }
 0x3cc   :  { %v712_v52 = vpop.f32.mrf.mxu0 }
 0x3cd   :  { %v713_v54 = vadd.f32 %v712_v52, %v711_v51 }
 0x3ce   :  { %v714_v55 = vpop.f32.mrf.mxu0 }
 0x3cf   :  { %v588_v57 = vadd.f32 %v713_v54, %v456_v53 }
 0x3d0   :  { %v715_v56 = vpop.f32.mrf.mxu0 }
 0x3d1   :  { %v716_v58 = vadd.f32 %v715_v56, %v714_v55  ;;  %v602_v62 = vadd.f32 %v588_v57, %v922_v18 }
 0x3d2   :  { %v717_v59 = vpop.f32.mrf.mxu1 }
 0x3d3   :  { %v591_v60 = vadd.f32 %v716_v58, %v456_v53 }
 0x3d4   :  { %v718_v61 = vpop.f32.mrf.mxu1 }
 0x3d5   :  { %v603_v63 = vadd.f32 %v591_v60, %v928_v22  ;;  %v719_v0 = vadd.f32 %v718_v61, %v717_v59 }
 0x3d6   :  { %v720_v1 = vpop.f32.mrf.mxu1 }
 0x3d7   :  { %v606_v2 = vadd.f32 %v603_v63, %v602_v62  ;;  %v596_v4 = vadd.f32 %v719_v0, %v456_v53 }
 0x3d8   :  { %v721_v11 = vpop.f32.mrf.mxu1 }
 0x3d9   :  { %v607_v3 = vrot.slane %v606_v2, 4  ;;  %v722_v5 = vadd.f32 %v721_v11, %v720_v1  ;;  %v604_v8 = vadd.f32 %v596_v4, %v920_v16 }
 0x3db   :  { %v608_v13 = vadd.f32 %v607_v3, %v606_v2  ;;  %v599_v6 = vadd.f32 %v722_v5, %v456_v53 }
 0x3dd   :  { %v609_v7 = vrot.slane %v608_v13, 2  ;;  %v605_v9 = vadd.f32 %v599_v6, %v925_v20 }
 0x3df   :  { %v613_v10 = vadd.f32 %v605_v9, %v604_v8  ;;  %v610_v14 = vadd.f32 %v609_v7, %v608_v13 }
 0x3e1   :  { %v614_v12 = vrot.slane %v613_v10, 4  ;;  %v611_v22 = vrot.slane %v610_v14, 1 }
 0x3e3   :  { %v615_v18 = vadd.f32 %v614_v12, %v613_v10  ;;  %v612_v19 = vadd.f32 %v611_v22, %v610_v14 }
 0x3e5   :  { %v616_v15 = vrot.slane %v615_v18, 2  ;;  %v621_v24 = vmul.f32 0.0625, %v612_v19 }
 0x3e7   :  { %v617_v17 = vadd.f32 %v616_v15, %v615_v18 }
 0x3e9   :  { %v618_v21 = vrot.slane %v617_v17, 1 }
 0x3eb   :  { %v619_v23 = vadd.f32 %v618_v21, %v617_v17 }
 0x3ed   :  { %v622_v25 = vmul.f32 0.0625, %v619_v23 }
 0x3ef   :  { %v626_v26 = vsel %vm625_vm0, %v622_v25, %v621_v24 }
 0x3f0   :  { %628 = vst [vmem:[#allocation2] sm:$0x3] %v626_v26 }
 0x3f1   :  { %838 = shalt.err (!%p835_p4)
}
 0x3f2   :  { %638 = dma.vmem_to_hbm [thread:$0]  %s636_s4, 32, %s1070_s5, [#allocation3]  }
 0x3f3   :  { %847 = dma.done.wait [#allocation3], 32  }
 0x3f4   :  { %848 = vsyncadd [#allocation3], 4294967264 }
 0x3f5   :  { %642 = vsyncpa [#allocation3], 1 }

</bundles_post_ra>
